<compile_context>
chip_gen: v5e
topology: v5e:2x2
jax: 0.10.0
libtpu: 0.0.40
codegen_flags: <defaults>
</compile_context>

<pallas_src>
import functools

import numpy as np

import jax
import jax.numpy as jnp
from jax import lax
from jax.experimental import pallas as pl
from jax.experimental.pallas import tpu as pltpu


# ---------------------------------------------------------------------------------
# Kernel.  Grid = (phase, batch_tile).  All activations are channel-major (C, Mt).
#   xt_ref : (n_phase, Cin, Mt)  phase-split, channel-major input tile
#   m1_ref : (9, Mt)             conv1 border masks (per-tile pattern, all tiles equal)
#   m2_ref : (9, Mt)             conv2 border masks
#   w1_ref : (9, Cout, Cin)      conv1 weights per tap
#   w2_ref : (9, Cout, Cout)     conv2 weights per tap
#   g*/b*  : (Cout, 1)           BN affine params
#   o_ref  : (Cout, Mt)          output tile
#   s1/q1/s2/q2 : (Cout, 1)      persistent BN sum / sum-of-squares accumulators
# ---------------------------------------------------------------------------------
def _basic_block_kernel(xt_ref, m1_ref, m2_ref, w1_ref, g1_ref, b1_ref,
                        w2_ref, g2_ref, b2_ref, o_ref,
                        s1_ref, q1_ref, s2_ref, q2_ref,
                        *, taps1, taps2, inv_count, q_pad, identity_sc, eps):
    p = pl.program_id(0)          # 0: BN1 stats, 1: BN2 stats, 2: finalize + store
    t = pl.program_id(1)          # batch tile

    @pl.when((p == 0) & (t == 0))
    def _init():
        s1_ref[...] = jnp.zeros_like(s1_ref)
        q1_ref[...] = jnp.zeros_like(q1_ref)
        s2_ref[...] = jnp.zeros_like(s2_ref)
        q2_ref[...] = jnp.zeros_like(q2_ref)

    xt = xt_ref[...]                                   # (n_phase, Cin, Mt)
    m1 = m1_ref[...]                                   # (9, Mt)
    w1 = w1_ref[...]                                   # (9, Cout, Cin)
    mt = o_ref.shape[1]
    ones_col = jnp.ones((mt, 1), jnp.float32)          # for MXU channel sums

    def conv_taps(src_fn, w, masks, taps):
        # 3x3 conv as 9 accumulated tap matmuls; tap slab = static lane-roll + mask.
        acc = None
        for k, (ph, sh, need_mask) in enumerate(taps):
            v = src_fn(ph)                             # (Cin, Mt)
            if sh:
                v = pltpu.roll(v, sh, axis=1)          # XLU lane rotation (static shift)
            if need_mask:
                v = v * masks[k:k + 1, :]              # zero the out-of-image taps
            term = jnp.dot(w[k], v, preferred_element_type=jnp.float32)
            acc = term if acc is None else acc + term
        return acc                                     # (Cout, Mt)

    # conv1 is recomputed every phase (cheaper than spilling y1 to HBM).
    y1 = conv_taps(lambda ph: xt[ph], w1, m1, taps1)   # (Cout, Mt)

    def scale_shift(s_ref, q_ref, g_ref, b_ref):
        mean = s_ref[...] * inv_count
        var = jnp.maximum(q_ref[...] * inv_count - mean * mean, 0.0)
        scale = g_ref[...] * lax.rsqrt(var + eps)      # EUP
        return scale, b_ref[...] - mean * scale

    @pl.when(p == 0)
    def _bn1_stats():
        s1_ref[...] += jnp.dot(y1, ones_col, preferred_element_type=jnp.float32)
        q1_ref[...] += jnp.dot(y1 * y1, ones_col, preferred_element_type=jnp.float32)

    @pl.when(p > 0)
    def _phase12():
        sc1, sh1 = scale_shift(s1_ref, q1_ref, g1_ref, b1_ref)
        h = jnp.maximum(y1 * sc1 + sh1, 0.0)           # BN1 + ReLU   (Cout, Mt)

        m2 = m2_ref[...]
        w2 = w2_ref[...]
        y2 = conv_taps(lambda ph: h, w2, m2, taps2)    # conv2        (Cout, Mt)

        @pl.when(p == 1)
        def _bn2_stats():
            s2_ref[...] += jnp.dot(y2, ones_col, preferred_element_type=jnp.float32)
            q2_ref[...] += jnp.dot(y2 * y2, ones_col, preferred_element_type=jnp.float32)

        @pl.when(p == 2)
        def _finalize():
            sc2, sh2 = scale_shift(s2_ref, q2_ref, g2_ref, b2_ref)
            if identity_sc:
                shortcut = xt[0]                       # identity: (Cout, Mt)
            else:
                # option 'A': phase (0,0) == x[:, :, ::2, ::2], zero-padded channels.
                z = jnp.zeros((q_pad, mt), jnp.float32)
                shortcut = jnp.concatenate([z, xt[0], z], axis=0)
            o_ref[...] = jnp.maximum(y2 * sc2 + sh2 + shortcut, 0.0)


# ---------------------------------------------------------------------------------
# BasicBlock forward (NCHW in / NCHW out, same semantics as the PyTorch module).
# ---------------------------------------------------------------------------------
def basic_block(x_nchw, params, *, stride=1, option="A", eps=1e-5):
    N, cin, H, W = x_nchw.shape
    cout = params["w1"].shape[0]                       # weights stored OIHW like PyTorch
    assert stride in (1, 2), "only stride 1 or 2 supported (what the module uses)"
    if stride == 2:
        assert H % 2 == 0 and W % 2 == 0, "stride-2 path assumes even spatial dims"
    Ho, Wo = H // stride, W // stride                  # k=3, pad=1
    M = N * Ho * Wo

    use_proj = (stride != 1) or (cin != cout)
    if use_proj:
        assert option == "A", "option 'B' shortcut not implemented"   # TODO(synk)
        assert stride == 2 and cin + 2 * (cout // 4) == cout, \
            "option-'A' shortcut supports the standard stride-2 / 2x-channel config"
    q_pad = cout // 4

    x = x_nchw.astype(jnp.float32)

    # ---- phase-split, channel-major input: (n_phase, Cin, M) --------------------
    if stride == 1:
        xtaps = jnp.transpose(x, (1, 0, 2, 3)).reshape(1, cin, M)
    else:
        slabs = []
        for a in range(2):
            for b in range(2):
                ph = x[:, :, a::2, b::2]                             # (N, Cin, Ho, Wo)
                slabs.append(jnp.transpose(ph, (1, 0, 2, 3)).reshape(cin, M))
        xtaps = jnp.stack(slabs, axis=0)                             # (4, Cin, M)
    n_phase = xtaps.shape[0]

    # ---- batch tile size (images per tile) --------------------------------------
    hw = Ho * Wo
    target = max(1, -(-2048 // hw))                    # ~2048 spatial positions / tile
    nb = N
    for cand in range(min(N, target), 0, -1):
        if N % cand == 0 and (cand == N or (cand * hw) % 128 == 0):
            nb = cand
            break
    mt = nb * hw
    n_tiles = N // nb

    # ---- static tap tables + border masks ----------------------------------------
    raw1 = []
    for kh in range(3):
        for kw in range(3):
            dh, dw = kh - 1, kw - 1
            if stride == 1:
                ph, dh2, dw2 = 0, dh, dw
            else:
                a, dh2 = (0, 0) if dh == 0 else ((1, 0) if dh == 1 else (1, -1))
                b, dw2 = (0, 0) if dw == 0 else ((1, 0) if dw == 1 else (1, -1))
                ph = 2 * a + b
            raw1.append((ph, dh2, dw2))
    raw2 = [(0, kh - 1, kw - 1) for kh in range(3) for kw in range(3)]

    def masks_for(raw):
        ho = np.arange(Ho)[:, None]
        wo = np.arange(Wo)[None, :]
        rows = []
        for _, dh, dw in raw:
            ok = ((ho + dh >= 0) & (ho + dh < Ho) & (wo + dw >= 0) & (wo + dw < Wo))
            rows.append(np.tile(ok.reshape(-1), nb))
        return np.stack(rows).astype(np.float32)       # (9, mt)

    m1_np, m2_np = masks_for(raw1), masks_for(raw2)

    def finalize(raw, masks_np):
        taps = []
        for k, (ph, dh, dw) in enumerate(raw):
            off = dh * Wo + dw
            taps.append((int(ph), int((-off) % mt), not bool(np.all(masks_np[k] == 1.0))))
        return tuple(taps)

    taps1, taps2 = finalize(raw1, m1_np), finalize(raw2, m2_np)
    m1, m2 = jnp.asarray(m1_np), jnp.asarray(m2_np)

    # ---- weights / BN params ------------------------------------------------------
    w1 = jnp.transpose(params["w1"], (2, 3, 0, 1)).reshape(9, cout, cin).astype(jnp.float32)
    w2 = jnp.transpose(params["w2"], (2, 3, 0, 1)).reshape(9, cout, cout).astype(jnp.float32)
    g1 = params["g1"].reshape(cout, 1).astype(jnp.float32)
    b1 = params["b1"].reshape(cout, 1).astype(jnp.float32)
    g2 = params["g2"].reshape(cout, 1).astype(jnp.float32)
    b2 = params["b2"].reshape(cout, 1).astype(jnp.float32)

    kern = functools.partial(
        _basic_block_kernel, taps1=taps1, taps2=taps2,
        inv_count=1.0 / float(M), q_pad=q_pad, identity_sc=not use_proj, eps=eps)

    out_cm = pl.pallas_call(
        kern,
        out_shape=jax.ShapeDtypeStruct((cout, M), jnp.float32),
        grid_spec=pltpu.PrefetchScalarGridSpec(
            num_scalar_prefetch=0,
            grid=(3, n_tiles),                         # (phase, batch tile)
            in_specs=[
                pl.BlockSpec((n_phase, cin, mt), lambda p, t: (0, 0, t)),
                pl.BlockSpec((9, mt), lambda p, t: (0, 0)),
                pl.BlockSpec((9, mt), lambda p, t: (0, 0)),
                pl.BlockSpec((9, cout, cin), lambda p, t: (0, 0, 0)),
                pl.BlockSpec((cout, 1), lambda p, t: (0, 0)),
                pl.BlockSpec((cout, 1), lambda p, t: (0, 0)),
                pl.BlockSpec((9, cout, cout), lambda p, t: (0, 0, 0)),
                pl.BlockSpec((cout, 1), lambda p, t: (0, 0)),
                pl.BlockSpec((cout, 1), lambda p, t: (0, 0)),
            ],
            out_specs=pl.BlockSpec((cout, mt), lambda p, t: (0, t)),
            scratch_shapes=[pltpu.VMEM((cout, 1), jnp.float32) for _ in range(4)],
        ),
        compiler_params=pltpu.CompilerParams(
            # Tile axis must stay 'arbitrary': BN accumulators are shared scratch.
            dimension_semantics=("arbitrary", "arbitrary"),
            vmem_limit_bytes=32 * 1024 * 1024,
        ),
    )(xtaps, m1, m2, w1, g1, b1, w2, g2, b2)

    out = out_cm.reshape(cout, N, Ho, Wo)
    return jnp.transpose(out, (1, 0, 2, 3))            # -> NCHW


# ---------------------------------------------------------------------------------
# Pure-JAX reference (correctness check only).
# ---------------------------------------------------------------------------------
def _ref_basic_block(x, p, *, stride):
    def conv(x, w, s):
        return lax.conv_general_dilated(
            x, w, (s, s), ((1, 1), (1, 1)),
            dimension_numbers=("NCHW", "OIHW", "NCHW"))

    def bn(y, g, b, eps=1e-5):
        mean = y.mean(axis=(0, 2, 3), keepdims=True)
        var = ((y - mean) ** 2).mean(axis=(0, 2, 3), keepdims=True)
        return (y - mean) * lax.rsqrt(var + eps) * g.reshape(1, -1, 1, 1) \
               + b.reshape(1, -1, 1, 1)

    in_planes = x.shape[1]
    planes = p["w1"].shape[0]
    out = jax.nn.relu(bn(conv(x, p["w1"], stride), p["g1"], p["b1"]))
    out = bn(conv(out, p["w2"], 1), p["g2"], p["b2"])
    if stride != 1 or in_planes != planes:
        q = planes // 4
        sc = jnp.pad(x[:, :, ::2, ::2], ((0, 0), (q, q), (0, 0), (0, 0)))
    else:
        sc = x
    return jax.nn.relu(out + sc)


if __name__ == "__main__":
    key = jax.random.PRNGKey(0)
    keys = jax.random.split(key, 13)

    # Block 1: in_planes=4 -> planes=8, stride=2 (exercises the option-'A' shortcut)
    N, H, W = 2, 16, 16
    in_planes, planes, stride = 4, 8, 2
    x = jax.random.normal(keys[0], (N, in_planes, H, W), jnp.float32)
    p1 = {
        "w1": 0.2 * jax.random.normal(keys[1], (planes, in_planes, 3, 3), jnp.float32),
        "w2": 0.2 * jax.random.normal(keys[2], (planes, planes, 3, 3), jnp.float32),
        "g1": 1.0 + 0.1 * jax.random.normal(keys[3], (planes,), jnp.float32),
        "b1": 0.1 * jax.random.normal(keys[4], (planes,), jnp.float32),
        "g2": 1.0 + 0.1 * jax.random.normal(keys[5], (planes,), jnp.float32),
        "b2": 0.1 * jax.random.normal(keys[6], (planes,), jnp.float32),
    }
    # Block 2: identity shortcut, stride=1
    p2 = {
        "w1": 0.2 * jax.random.normal(keys[7], (planes, planes, 3, 3), jnp.float32),
        "w2": 0.2 * jax.random.normal(keys[8], (planes, planes, 3, 3), jnp.float32),
        "g1": 1.0 + 0.1 * jax.random.normal(keys[9], (planes,), jnp.float32),
        "b1": 0.1 * jax.random.normal(keys[10], (planes,), jnp.float32),
        "g2": 1.0 + 0.1 * jax.random.normal(keys[11], (planes,), jnp.float32),
        "b2": 0.1 * jax.random.normal(keys[12], (planes,), jnp.float32),
    }

    out1 = basic_block(x, p1, stride=stride, option="A")
    out2 = basic_block(out1, p2, stride=1, option="A")
    out1, out2 = jax.block_until_ready((out1, out2))

    ref1 = _ref_basic_block(x, p1, stride=stride)
    ref2 = _ref_basic_block(ref1, p2, stride=1)
    ref1, ref2 = jax.block_until_ready((ref1, ref2))

    assert out1.shape == (N, planes, H // stride, W // stride), out1.shape
    assert out2.shape == out1.shape, out2.shape
    assert bool(jnp.all(jnp.isfinite(out1))) and bool(jnp.all(jnp.isfinite(out2)))
    err1 = float(jnp.max(jnp.abs(out1 - ref1)))
    err2 = float(jnp.max(jnp.abs(out2 - ref2)))
    assert bool(jnp.allclose(out1, ref1, atol=2e-2, rtol=2e-2)), err1
    assert bool(jnp.allclose(out2, ref2, atol=2e-2, rtol=2e-2)), err2

    print("KERNEL_OK")
</pallas_src>

<mosaic_0001>
module attributes {stable_mosaic.version = 11 : i64} {
  func.func @_basic_block_kernel(%arg0: i32, %arg1: i32, %arg2: memref<4x4x128xf32, #tpu.memory_space<vmem>>, %arg3: memref<9x128xf32, #tpu.memory_space<vmem>>, %arg4: memref<9x128xf32, #tpu.memory_space<vmem>>, %arg5: memref<9x8x4xf32, #tpu.memory_space<vmem>>, %arg6: memref<8x1xf32, #tpu.memory_space<vmem>>, %arg7: memref<8x1xf32, #tpu.memory_space<vmem>>, %arg8: memref<9x8x8xf32, #tpu.memory_space<vmem>>, %arg9: memref<8x1xf32, #tpu.memory_space<vmem>>, %arg10: memref<8x1xf32, #tpu.memory_space<vmem>>, %arg11: memref<8x128xf32, #tpu.memory_space<vmem>>, %arg12: memref<8x1xf32, #tpu.memory_space<vmem>>, %arg13: memref<8x1xf32, #tpu.memory_space<vmem>>, %arg14: memref<8x1xf32, #tpu.memory_space<vmem>>, %arg15: memref<8x1xf32, #tpu.memory_space<vmem>>) attributes {dimension_semantics = [#tpu.dimension_semantics<arbitrary>, #tpu.dimension_semantics<arbitrary>], iteration_bounds = array<i64: 3, 1>, scalar_prefetch = 0 : i64, scratch_operands = 4 : i64, tpu.core_type = #tpu.core_type<tc>, window_params = [{transform_indices = @transform_0, window_bounds = array<i64: 4, 4, 128>}, {pipeline_mode = #tpu.pipeline_mode<synchronous>, transform_indices = @transform_1, window_bounds = array<i64: 9, 128>}, {pipeline_mode = #tpu.pipeline_mode<synchronous>, transform_indices = @transform_2, window_bounds = array<i64: 9, 128>}, {pipeline_mode = #tpu.pipeline_mode<synchronous>, transform_indices = @transform_3, window_bounds = array<i64: 9, 8, 4>}, {pipeline_mode = #tpu.pipeline_mode<synchronous>, transform_indices = @transform_4, window_bounds = array<i64: 8, 1>}, {pipeline_mode = #tpu.pipeline_mode<synchronous>, transform_indices = @transform_5, window_bounds = array<i64: 8, 1>}, {pipeline_mode = #tpu.pipeline_mode<synchronous>, transform_indices = @transform_6, window_bounds = array<i64: 9, 8, 8>}, {pipeline_mode = #tpu.pipeline_mode<synchronous>, transform_indices = @transform_7, window_bounds = array<i64: 8, 1>}, {pipeline_mode = #tpu.pipeline_mode<synchronous>, transform_indices = @transform_8, window_bounds = array<i64: 8, 1>}, {transform_indices = @transform_9, window_bounds = array<i64: 8, 128>}]} {
    %c0_i32 = arith.constant 0 : i32
    %0 = arith.cmpi eq, %arg0, %c0_i32 : i32
    %c0_i32_0 = arith.constant 0 : i32
    %1 = arith.cmpi eq, %arg1, %c0_i32_0 : i32
    %2 = arith.andi %0, %1 : i1
    %3 = arith.extui %2 : i1 to i32
    %c0_i32_1 = arith.constant 0 : i32
    %4 = arith.cmpi ne, %3, %c0_i32_1 : i32
    scf.if %4 {
      %cst_24 = arith.constant 0.000000e+00 : f32
      %88 = vector.broadcast %cst_24 : f32 to vector<8x1xf32>
      %c0_25 = arith.constant 0 : index
      %c0_26 = arith.constant 0 : index
      %89 = vector.load %arg12[%c0_25, %c0_26] : memref<8x1xf32, #tpu.memory_space<vmem>>, vector<8x1xf32>
      tpu.vector_store %arg12[%c0_25, %c0_26], %88 {strides = array<i32>} : memref<8x1xf32, #tpu.memory_space<vmem>>, vector<8x1xf32>,
      %cst_27 = arith.constant 0.000000e+00 : f32
      %90 = vector.broadcast %cst_27 : f32 to vector<8x1xf32>
      %c0_28 = arith.constant 0 : index
      %c0_29 = arith.constant 0 : index
      %91 = vector.load %arg13[%c0_28, %c0_29] : memref<8x1xf32, #tpu.memory_space<vmem>>, vector<8x1xf32>
      tpu.vector_store %arg13[%c0_28, %c0_29], %90 {strides = array<i32>} : memref<8x1xf32, #tpu.memory_space<vmem>>, vector<8x1xf32>,
      %cst_30 = arith.constant 0.000000e+00 : f32
      %92 = vector.broadcast %cst_30 : f32 to vector<8x1xf32>
      %c0_31 = arith.constant 0 : index
      %c0_32 = arith.constant 0 : index
      %93 = vector.load %arg14[%c0_31, %c0_32] : memref<8x1xf32, #tpu.memory_space<vmem>>, vector<8x1xf32>
      tpu.vector_store %arg14[%c0_31, %c0_32], %92 {strides = array<i32>} : memref<8x1xf32, #tpu.memory_space<vmem>>, vector<8x1xf32>,
      %cst_33 = arith.constant 0.000000e+00 : f32
      %94 = vector.broadcast %cst_33 : f32 to vector<8x1xf32>
      %c0_34 = arith.constant 0 : index
      %c0_35 = arith.constant 0 : index
      %95 = vector.load %arg15[%c0_34, %c0_35] : memref<8x1xf32, #tpu.memory_space<vmem>>, vector<8x1xf32>
      tpu.vector_store %arg15[%c0_34, %c0_35], %94 {strides = array<i32>} : memref<8x1xf32, #tpu.memory_space<vmem>>, vector<8x1xf32>,
    } else {
    }
    %c0 = arith.constant 0 : index
    %c0_2 = arith.constant 0 : index
    %c0_3 = arith.constant 0 : index
    %5 = vector.load %arg2[%c0, %c0_2, %c0_3] : memref<4x4x128xf32, #tpu.memory_space<vmem>>, vector<4x4x128xf32>
    %c0_4 = arith.constant 0 : index
    %c0_5 = arith.constant 0 : index
    %6 = vector.load %arg3[%c0_4, %c0_5] : memref<9x128xf32, #tpu.memory_space<vmem>>, vector<9x128xf32>
    %c0_6 = arith.constant 0 : index
    %c0_7 = arith.constant 0 : index
    %c0_8 = arith.constant 0 : index
    %7 = vector.load %arg5[%c0_6, %c0_7, %c0_8] : memref<9x8x4xf32, #tpu.memory_space<vmem>>, vector<9x8x4xf32>
    %cst = arith.constant 1.000000e+00 : f32
    %8 = vector.broadcast %cst : f32 to vector<128x1xf32>
    %9 = vector.extract_strided_slice %5 {offsets = [3, 0, 0], sizes = [1, 4, 128], strides = [1, 1, 1]} : vector<4x4x128xf32> to vector<1x4x128xf32>
    %10 = vector.shape_cast %9 : vector<1x4x128xf32> to vector<4x128xf32>
    %c9_i32 = arith.constant 9 : i32
    %11 = tpu.dynamic_rotate %10 by %c9_i32 dim 1 : vector<4x128xf32>, i32 -> vector<4x128xf32>
    %12 = vector.extract_strided_slice %6 {offsets = [0, 0], sizes = [1, 128], strides = [1, 1]} : vector<9x128xf32> to vector<1x128xf32>
    %13 = vector.broadcast %12 : vector<1x128xf32> to vector<4x128xf32>
    %14 = arith.mulf %11, %13 : vector<4x128xf32>
    %15 = vector.extract_strided_slice %7 {offsets = [0, 0, 0], sizes = [1, 8, 4], strides = [1, 1, 1]} : vector<9x8x4xf32> to vector<1x8x4xf32>
    %16 = vector.shape_cast %15 : vector<1x8x4xf32> to vector<8x4xf32>
    %cst_9 = arith.constant dense<0.000000e+00> : vector<8x128xf32>
    %17 = tpu.matmul %16, %14, %cst_9 {dimension_numbers = #tpu.dot_dimension_numbers<[1], [0], [0], [1], [0, 0, 1, 1], [], []>} : vector<8x4xf32>, vector<4x128xf32>, vector<8x128xf32> -> vector<8x128xf32>
    %18 = vector.extract_strided_slice %5 {offsets = [2, 0, 0], sizes = [1, 4, 128], strides = [1, 1, 1]} : vector<4x4x128xf32> to vector<1x4x128xf32>
    %19 = vector.shape_cast %18 : vector<1x4x128xf32> to vector<4x128xf32>
    %c8_i32 = arith.constant 8 : i32
    %20 = tpu.dynamic_rotate %19 by %c8_i32 dim 1 : vector<4x128xf32>, i32 -> vector<4x128xf32>
    %21 = vector.extract_strided_slice %6 {offsets = [1, 0], sizes = [1, 128], strides = [1, 1]} : vector<9x128xf32> to vector<1x128xf32>
    %22 = vector.broadcast %21 : vector<1x128xf32> to vector<4x128xf32>
    %23 = arith.mulf %20, %22 : vector<4x128xf32>
    %24 = vector.extract_strided_slice %7 {offsets = [1, 0, 0], sizes = [1, 8, 4], strides = [1, 1, 1]} : vector<9x8x4xf32> to vector<1x8x4xf32>
    %25 = vector.shape_cast %24 : vector<1x8x4xf32> to vector<8x4xf32>
    %cst_10 = arith.constant dense<0.000000e+00> : vector<8x128xf32>
    %26 = tpu.matmul %25, %23, %cst_10 {dimension_numbers = #tpu.dot_dimension_numbers<[1], [0], [0], [1], [0, 0, 1, 1], [], []>} : vector<8x4xf32>, vector<4x128xf32>, vector<8x128xf32> -> vector<8x128xf32>
    %27 = arith.addf %17, %26 : vector<8x128xf32>
    %28 = vector.extract_strided_slice %5 {offsets = [3, 0, 0], sizes = [1, 4, 128], strides = [1, 1, 1]} : vector<4x4x128xf32> to vector<1x4x128xf32>
    %29 = vector.shape_cast %28 : vector<1x4x128xf32> to vector<4x128xf32>
    %c8_i32_11 = arith.constant 8 : i32
    %30 = tpu.dynamic_rotate %29 by %c8_i32_11 dim 1 : vector<4x128xf32>, i32 -> vector<4x128xf32>
    %31 = vector.extract_strided_slice %6 {offsets = [2, 0], sizes = [1, 128], strides = [1, 1]} : vector<9x128xf32> to vector<1x128xf32>
    %32 = vector.broadcast %31 : vector<1x128xf32> to vector<4x128xf32>
    %33 = arith.mulf %30, %32 : vector<4x128xf32>
    %34 = vector.extract_strided_slice %7 {offsets = [2, 0, 0], sizes = [1, 8, 4], strides = [1, 1, 1]} : vector<9x8x4xf32> to vector<1x8x4xf32>
    %35 = vector.shape_cast %34 : vector<1x8x4xf32> to vector<8x4xf32>
    %cst_12 = arith.constant dense<0.000000e+00> : vector<8x128xf32>
    %36 = tpu.matmul %35, %33, %cst_12 {dimension_numbers = #tpu.dot_dimension_numbers<[1], [0], [0], [1], [0, 0, 1, 1], [], []>} : vector<8x4xf32>, vector<4x128xf32>, vector<8x128xf32> -> vector<8x128xf32>
    %37 = arith.addf %27, %36 : vector<8x128xf32>
    %38 = vector.extract_strided_slice %5 {offsets = [1, 0, 0], sizes = [1, 4, 128], strides = [1, 1, 1]} : vector<4x4x128xf32> to vector<1x4x128xf32>
    %39 = vector.shape_cast %38 : vector<1x4x128xf32> to vector<4x128xf32>
    %c1_i32 = arith.constant 1 : i32
    %40 = tpu.dynamic_rotate %39 by %c1_i32 dim 1 : vector<4x128xf32>, i32 -> vector<4x128xf32>
    %41 = vector.extract_strided_slice %6 {offsets = [3, 0], sizes = [1, 128], strides = [1, 1]} : vector<9x128xf32> to vector<1x128xf32>
    %42 = vector.broadcast %41 : vector<1x128xf32> to vector<4x128xf32>
    %43 = arith.mulf %40, %42 : vector<4x128xf32>
    %44 = vector.extract_strided_slice %7 {offsets = [3, 0, 0], sizes = [1, 8, 4], strides = [1, 1, 1]} : vector<9x8x4xf32> to vector<1x8x4xf32>
    %45 = vector.shape_cast %44 : vector<1x8x4xf32> to vector<8x4xf32>
    %cst_13 = arith.constant dense<0.000000e+00> : vector<8x128xf32>
    %46 = tpu.matmul %45, %43, %cst_13 {dimension_numbers = #tpu.dot_dimension_numbers<[1], [0], [0], [1], [0, 0, 1, 1], [], []>} : vector<8x4xf32>, vector<4x128xf32>, vector<8x128xf32> -> vector<8x128xf32>
    %47 = arith.addf %37, %46 : vector<8x128xf32>
    %48 = vector.extract_strided_slice %5 {offsets = [0, 0, 0], sizes = [1, 4, 128], strides = [1, 1, 1]} : vector<4x4x128xf32> to vector<1x4x128xf32>
    %49 = vector.shape_cast %48 : vector<1x4x128xf32> to vector<4x128xf32>
    %50 = vector.extract_strided_slice %7 {offsets = [4, 0, 0], sizes = [1, 8, 4], strides = [1, 1, 1]} : vector<9x8x4xf32> to vector<1x8x4xf32>
    %51 = vector.shape_cast %50 : vector<1x8x4xf32> to vector<8x4xf32>
    %cst_14 = arith.constant dense<0.000000e+00> : vector<8x128xf32>
    %52 = tpu.matmul %51, %49, %cst_14 {dimension_numbers = #tpu.dot_dimension_numbers<[1], [0], [0], [1], [0, 0, 1, 1], [], []>} : vector<8x4xf32>, vector<4x128xf32>, vector<8x128xf32> -> vector<8x128xf32>
    %53 = arith.addf %47, %52 : vector<8x128xf32>
    %54 = vector.extract_strided_slice %5 {offsets = [1, 0, 0], sizes = [1, 4, 128], strides = [1, 1, 1]} : vector<4x4x128xf32> to vector<1x4x128xf32>
    %55 = vector.shape_cast %54 : vector<1x4x128xf32> to vector<4x128xf32>
    %56 = vector.extract_strided_slice %7 {offsets = [5, 0, 0], sizes = [1, 8, 4], strides = [1, 1, 1]} : vector<9x8x4xf32> to vector<1x8x4xf32>
    %57 = vector.shape_cast %56 : vector<1x8x4xf32> to vector<8x4xf32>
    %cst_15 = arith.constant dense<0.000000e+00> : vector<8x128xf32>
    %58 = tpu.matmul %57, %55, %cst_15 {dimension_numbers = #tpu.dot_dimension_numbers<[1], [0], [0], [1], [0, 0, 1, 1], [], []>} : vector<8x4xf32>, vector<4x128xf32>, vector<8x128xf32> -> vector<8x128xf32>
    %59 = arith.addf %53, %58 : vector<8x128xf32>
    %60 = vector.extract_strided_slice %5 {offsets = [3, 0, 0], sizes = [1, 4, 128], strides = [1, 1, 1]} : vector<4x4x128xf32> to vector<1x4x128xf32>
    %61 = vector.shape_cast %60 : vector<1x4x128xf32> to vector<4x128xf32>
    %c1_i32_16 = arith.constant 1 : i32
    %62 = tpu.dynamic_rotate %61 by %c1_i32_16 dim 1 : vector<4x128xf32>, i32 -> vector<4x128xf32>
    %63 = vector.extract_strided_slice %6 {offsets = [6, 0], sizes = [1, 128], strides = [1, 1]} : vector<9x128xf32> to vector<1x128xf32>
    %64 = vector.broadcast %63 : vector<1x128xf32> to vector<4x128xf32>
    %65 = arith.mulf %62, %64 : vector<4x128xf32>
    %66 = vector.extract_strided_slice %7 {offsets = [6, 0, 0], sizes = [1, 8, 4], strides = [1, 1, 1]} : vector<9x8x4xf32> to vector<1x8x4xf32>
    %67 = vector.shape_cast %66 : vector<1x8x4xf32> to vector<8x4xf32>
    %cst_17 = arith.constant dense<0.000000e+00> : vector<8x128xf32>
    %68 = tpu.matmul %67, %65, %cst_17 {dimension_numbers = #tpu.dot_dimension_numbers<[1], [0], [0], [1], [0, 0, 1, 1], [], []>} : vector<8x4xf32>, vector<4x128xf32>, vector<8x128xf32> -> vector<8x128xf32>
    %69 = arith.addf %59, %68 : vector<8x128xf32>
    %70 = vector.extract_strided_slice %5 {offsets = [2, 0, 0], sizes = [1, 4, 128], strides = [1, 1, 1]} : vector<4x4x128xf32> to vector<1x4x128xf32>
    %71 = vector.shape_cast %70 : vector<1x4x128xf32> to vector<4x128xf32>
    %72 = vector.extract_strided_slice %7 {offsets = [7, 0, 0], sizes = [1, 8, 4], strides = [1, 1, 1]} : vector<9x8x4xf32> to vector<1x8x4xf32>
    %73 = vector.shape_cast %72 : vector<1x8x4xf32> to vector<8x4xf32>
    %cst_18 = arith.constant dense<0.000000e+00> : vector<8x128xf32>
    %74 = tpu.matmul %73, %71, %cst_18 {dimension_numbers = #tpu.dot_dimension_numbers<[1], [0], [0], [1], [0, 0, 1, 1], [], []>} : vector<8x4xf32>, vector<4x128xf32>, vector<8x128xf32> -> vector<8x128xf32>
    %75 = arith.addf %69, %74 : vector<8x128xf32>
    %76 = vector.extract_strided_slice %5 {offsets = [3, 0, 0], sizes = [1, 4, 128], strides = [1, 1, 1]} : vector<4x4x128xf32> to vector<1x4x128xf32>
    %77 = vector.shape_cast %76 : vector<1x4x128xf32> to vector<4x128xf32>
    %78 = vector.extract_strided_slice %7 {offsets = [8, 0, 0], sizes = [1, 8, 4], strides = [1, 1, 1]} : vector<9x8x4xf32> to vector<1x8x4xf32>
    %79 = vector.shape_cast %78 : vector<1x8x4xf32> to vector<8x4xf32>
    %cst_19 = arith.constant dense<0.000000e+00> : vector<8x128xf32>
    %80 = tpu.matmul %79, %77, %cst_19 {dimension_numbers = #tpu.dot_dimension_numbers<[1], [0], [0], [1], [0, 0, 1, 1], [], []>} : vector<8x4xf32>, vector<4x128xf32>, vector<8x128xf32> -> vector<8x128xf32>
    %81 = arith.addf %75, %80 : vector<8x128xf32>
    %c0_i32_20 = arith.constant 0 : i32
    %82 = arith.cmpi eq, %arg0, %c0_i32_20 : i32
    %83 = arith.extui %82 : i1 to i32
    %c0_i32_21 = arith.constant 0 : i32
    %84 = arith.cmpi ne, %83, %c0_i32_21 : i32
    scf.if %84 {
      %c0_24 = arith.constant 0 : index
      %c0_25 = arith.constant 0 : index
      %88 = vector.load %arg12[%c0_24, %c0_25] : memref<8x1xf32, #tpu.memory_space<vmem>>, vector<8x1xf32>
      %cst_26 = arith.constant dense<0.000000e+00> : vector<8x1xf32>
      %89 = tpu.matmul %81, %8, %cst_26 {dimension_numbers = #tpu.dot_dimension_numbers<[1], [0], [0], [1], [0, 0, 1, 1], [], []>} : vector<8x128xf32>, vector<128x1xf32>, vector<8x1xf32> -> vector<8x1xf32>
      %90 = arith.addf %88, %89 : vector<8x1xf32>
      %c0_27 = arith.constant 0 : index
      %c0_28 = arith.constant 0 : index
      %91 = vector.load %arg12[%c0_27, %c0_28] : memref<8x1xf32, #tpu.memory_space<vmem>>, vector<8x1xf32>
      tpu.vector_store %arg12[%c0_27, %c0_28], %90 {strides = array<i32>} : memref<8x1xf32, #tpu.memory_space<vmem>>, vector<8x1xf32>,
      %c0_29 = arith.constant 0 : index
      %c0_30 = arith.constant 0 : index
      %92 = vector.load %arg13[%c0_29, %c0_30] : memref<8x1xf32, #tpu.memory_space<vmem>>, vector<8x1xf32>
      %93 = arith.mulf %81, %81 : vector<8x128xf32>
      %cst_31 = arith.constant dense<0.000000e+00> : vector<8x1xf32>
      %94 = tpu.matmul %93, %8, %cst_31 {dimension_numbers = #tpu.dot_dimension_numbers<[1], [0], [0], [1], [0, 0, 1, 1], [], []>} : vector<8x128xf32>, vector<128x1xf32>, vector<8x1xf32> -> vector<8x1xf32>
      %95 = arith.addf %92, %94 : vector<8x1xf32>
      %c0_32 = arith.constant 0 : index
      %c0_33 = arith.constant 0 : index
      %96 = vector.load %arg13[%c0_32, %c0_33] : memref<8x1xf32, #tpu.memory_space<vmem>>, vector<8x1xf32>
      tpu.vector_store %arg13[%c0_32, %c0_33], %95 {strides = array<i32>} : memref<8x1xf32, #tpu.memory_space<vmem>>, vector<8x1xf32>,
    } else {
    }
    %c0_i32_22 = arith.constant 0 : i32
    %85 = arith.cmpi sgt, %arg0, %c0_i32_22 : i32
    %86 = arith.extui %85 : i1 to i32
    %c0_i32_23 = arith.constant 0 : i32
    %87 = arith.cmpi ne, %86, %c0_i32_23 : i32
    scf.if %87 {
      %c0_24 = arith.constant 0 : index
      %c0_25 = arith.constant 0 : index
      %88 = vector.load %arg12[%c0_24, %c0_25] : memref<8x1xf32, #tpu.memory_space<vmem>>, vector<8x1xf32>
      %cst_26 = arith.constant 7.812500e-03 : f32
      %89 = vector.broadcast %cst_26 : f32 to vector<8x1xf32>
      %90 = arith.mulf %88, %89 : vector<8x1xf32>
      %c0_27 = arith.constant 0 : index
      %c0_28 = arith.constant 0 : index
      %91 = vector.load %arg13[%c0_27, %c0_28] : memref<8x1xf32, #tpu.memory_space<vmem>>, vector<8x1xf32>
      %cst_29 = arith.constant 7.812500e-03 : f32
      %92 = vector.broadcast %cst_29 : f32 to vector<8x1xf32>
      %93 = arith.mulf %91, %92 : vector<8x1xf32>
      %94 = arith.mulf %90, %90 : vector<8x1xf32>
      %95 = arith.subf %93, %94 : vector<8x1xf32>
      %cst_30 = arith.constant 0.000000e+00 : f32
      %96 = vector.broadcast %cst_30 : f32 to vector<8x1xf32>
      %97 = arith.maximumf %95, %96 : vector<8x1xf32>
      %c0_31 = arith.constant 0 : index
      %c0_32 = arith.constant 0 : index
      %98 = vector.load %arg6[%c0_31, %c0_32] : memref<8x1xf32, #tpu.memory_space<vmem>>, vector<8x1xf32>
      %cst_33 = arith.constant 9.99999974E-6 : f32
      %99 = vector.broadcast %cst_33 : f32 to vector<8x1xf32>
      %100 = arith.addf %97, %99 : vector<8x1xf32>
      %101 = math.rsqrt %100 : vector<8x1xf32>
      %102 = arith.mulf %98, %101 : vector<8x1xf32>
      %c0_34 = arith.constant 0 : index
      %c0_35 = arith.constant 0 : index
      %103 = vector.load %arg7[%c0_34, %c0_35] : memref<8x1xf32, #tpu.memory_space<vmem>>, vector<8x1xf32>
      %104 = arith.mulf %90, %102 : vector<8x1xf32>
      %105 = arith.subf %103, %104 : vector<8x1xf32>
      %106 = vector.broadcast %102 : vector<8x1xf32> to vector<8x128xf32>
      %107 = arith.mulf %81, %106 : vector<8x128xf32>
      %108 = vector.broadcast %105 : vector<8x1xf32> to vector<8x128xf32>
      %109 = arith.addf %107, %108 : vector<8x128xf32>
      %cst_36 = arith.constant 0.000000e+00 : f32
      %110 = vector.broadcast %cst_36 : f32 to vector<8x128xf32>
      %111 = arith.maximumf %109, %110 : vector<8x128xf32>
      %c0_37 = arith.constant 0 : index
      %c0_38 = arith.constant 0 : index
      %112 = vector.load %arg4[%c0_37, %c0_38] : memref<9x128xf32, #tpu.memory_space<vmem>>, vector<9x128xf32>
      %c0_39 = arith.constant 0 : index
      %c0_40 = arith.constant 0 : index
      %c0_41 = arith.constant 0 : index
      %113 = vector.load %arg8[%c0_39, %c0_40, %c0_41] : memref<9x8x8xf32, #tpu.memory_space<vmem>>, vector<9x8x8xf32>
      %c9_i32_42 = arith.constant 9 : i32
      %114 = tpu.dynamic_rotate %111 by %c9_i32_42 dim 1 : vector<8x128xf32>, i32 -> vector<8x128xf32>
      %115 = vector.extract_strided_slice %112 {offsets = [0, 0], sizes = [1, 128], strides = [1, 1]} : vector<9x128xf32> to vector<1x128xf32>
      %116 = vector.broadcast %115 : vector<1x128xf32> to vector<8x128xf32>
      %117 = arith.mulf %114, %116 : vector<8x128xf32>
      %118 = vector.extract_strided_slice %113 {offsets = [0, 0, 0], sizes = [1, 8, 8], strides = [1, 1, 1]} : vector<9x8x8xf32> to vector<1x8x8xf32>
      %119 = vector.shape_cast %118 : vector<1x8x8xf32> to vector<8x8xf32>
      %cst_43 = arith.constant dense<0.000000e+00> : vector<8x128xf32>
      %120 = tpu.matmul %119, %117, %cst_43 {dimension_numbers = #tpu.dot_dimension_numbers<[1], [0], [0], [1], [0, 0, 1, 1], [], []>} : vector<8x8xf32>, vector<8x128xf32>, vector<8x128xf32> -> vector<8x128xf32>
      %c8_i32_44 = arith.constant 8 : i32
      %121 = tpu.dynamic_rotate %111 by %c8_i32_44 dim 1 : vector<8x128xf32>, i32 -> vector<8x128xf32>
      %122 = vector.extract_strided_slice %112 {offsets = [1, 0], sizes = [1, 128], strides = [1, 1]} : vector<9x128xf32> to vector<1x128xf32>
      %123 = vector.broadcast %122 : vector<1x128xf32> to vector<8x128xf32>
      %124 = arith.mulf %121, %123 : vector<8x128xf32>
      %125 = vector.extract_strided_slice %113 {offsets = [1, 0, 0], sizes = [1, 8, 8], strides = [1, 1, 1]} : vector<9x8x8xf32> to vector<1x8x8xf32>
      %126 = vector.shape_cast %125 : vector<1x8x8xf32> to vector<8x8xf32>
      %cst_45 = arith.constant dense<0.000000e+00> : vector<8x128xf32>
      %127 = tpu.matmul %126, %124, %cst_45 {dimension_numbers = #tpu.dot_dimension_numbers<[1], [0], [0], [1], [0, 0, 1, 1], [], []>} : vector<8x8xf32>, vector<8x128xf32>, vector<8x128xf32> -> vector<8x128xf32>
      %128 = arith.addf %120, %127 : vector<8x128xf32>
      %c7_i32 = arith.constant 7 : i32
      %129 = tpu.dynamic_rotate %111 by %c7_i32 dim 1 : vector<8x128xf32>, i32 -> vector<8x128xf32>
      %130 = vector.extract_strided_slice %112 {offsets = [2, 0], sizes = [1, 128], strides = [1, 1]} : vector<9x128xf32> to vector<1x128xf32>
      %131 = vector.broadcast %130 : vector<1x128xf32> to vector<8x128xf32>
      %132 = arith.mulf %129, %131 : vector<8x128xf32>
      %133 = vector.extract_strided_slice %113 {offsets = [2, 0, 0], sizes = [1, 8, 8], strides = [1, 1, 1]} : vector<9x8x8xf32> to vector<1x8x8xf32>
      %134 = vector.shape_cast %133 : vector<1x8x8xf32> to vector<8x8xf32>
      %cst_46 = arith.constant dense<0.000000e+00> : vector<8x128xf32>
      %135 = tpu.matmul %134, %132, %cst_46 {dimension_numbers = #tpu.dot_dimension_numbers<[1], [0], [0], [1], [0, 0, 1, 1], [], []>} : vector<8x8xf32>, vector<8x128xf32>, vector<8x128xf32> -> vector<8x128xf32>
      %136 = arith.addf %128, %135 : vector<8x128xf32>
      %c1_i32_47 = arith.constant 1 : i32
      %137 = tpu.dynamic_rotate %111 by %c1_i32_47 dim 1 : vector<8x128xf32>, i32 -> vector<8x128xf32>
      %138 = vector.extract_strided_slice %112 {offsets = [3, 0], sizes = [1, 128], strides = [1, 1]} : vector<9x128xf32> to vector<1x128xf32>
      %139 = vector.broadcast %138 : vector<1x128xf32> to vector<8x128xf32>
      %140 = arith.mulf %137, %139 : vector<8x128xf32>
      %141 = vector.extract_strided_slice %113 {offsets = [3, 0, 0], sizes = [1, 8, 8], strides = [1, 1, 1]} : vector<9x8x8xf32> to vector<1x8x8xf32>
      %142 = vector.shape_cast %141 : vector<1x8x8xf32> to vector<8x8xf32>
      %cst_48 = arith.constant dense<0.000000e+00> : vector<8x128xf32>
      %143 = tpu.matmul %142, %140, %cst_48 {dimension_numbers = #tpu.dot_dimension_numbers<[1], [0], [0], [1], [0, 0, 1, 1], [], []>} : vector<8x8xf32>, vector<8x128xf32>, vector<8x128xf32> -> vector<8x128xf32>
      %144 = arith.addf %136, %143 : vector<8x128xf32>
      %145 = vector.extract_strided_slice %113 {offsets = [4, 0, 0], sizes = [1, 8, 8], strides = [1, 1, 1]} : vector<9x8x8xf32> to vector<1x8x8xf32>
      %146 = vector.shape_cast %145 : vector<1x8x8xf32> to vector<8x8xf32>
      %cst_49 = arith.constant dense<0.000000e+00> : vector<8x128xf32>
      %147 = tpu.matmul %146, %111, %cst_49 {dimension_numbers = #tpu.dot_dimension_numbers<[1], [0], [0], [1], [0, 0, 1, 1], [], []>} : vector<8x8xf32>, vector<8x128xf32>, vector<8x128xf32> -> vector<8x128xf32>
      %148 = arith.addf %144, %147 : vector<8x128xf32>
      %c127_i32 = arith.constant 127 : i32
      %149 = tpu.dynamic_rotate %111 by %c127_i32 dim 1 : vector<8x128xf32>, i32 -> vector<8x128xf32>
      %150 = vector.extract_strided_slice %112 {offsets = [5, 0], sizes = [1, 128], strides = [1, 1]} : vector<9x128xf32> to vector<1x128xf32>
      %151 = vector.broadcast %150 : vector<1x128xf32> to vector<8x128xf32>
      %152 = arith.mulf %149, %151 : vector<8x128xf32>
      %153 = vector.extract_strided_slice %113 {offsets = [5, 0, 0], sizes = [1, 8, 8], strides = [1, 1, 1]} : vector<9x8x8xf32> to vector<1x8x8xf32>
      %154 = vector.shape_cast %153 : vector<1x8x8xf32> to vector<8x8xf32>
      %cst_50 = arith.constant dense<0.000000e+00> : vector<8x128xf32>
      %155 = tpu.matmul %154, %152, %cst_50 {dimension_numbers = #tpu.dot_dimension_numbers<[1], [0], [0], [1], [0, 0, 1, 1], [], []>} : vector<8x8xf32>, vector<8x128xf32>, vector<8x128xf32> -> vector<8x128xf32>
      %156 = arith.addf %148, %155 : vector<8x128xf32>
      %c121_i32 = arith.constant 121 : i32
      %157 = tpu.dynamic_rotate %111 by %c121_i32 dim 1 : vector<8x128xf32>, i32 -> vector<8x128xf32>
      %158 = vector.extract_strided_slice %112 {offsets = [6, 0], sizes = [1, 128], strides = [1, 1]} : vector<9x128xf32> to vector<1x128xf32>
      %159 = vector.broadcast %158 : vector<1x128xf32> to vector<8x128xf32>
      %160 = arith.mulf %157, %159 : vector<8x128xf32>
      %161 = vector.extract_strided_slice %113 {offsets = [6, 0, 0], sizes = [1, 8, 8], strides = [1, 1, 1]} : vector<9x8x8xf32> to vector<1x8x8xf32>
      %162 = vector.shape_cast %161 : vector<1x8x8xf32> to vector<8x8xf32>
      %cst_51 = arith.constant dense<0.000000e+00> : vector<8x128xf32>
      %163 = tpu.matmul %162, %160, %cst_51 {dimension_numbers = #tpu.dot_dimension_numbers<[1], [0], [0], [1], [0, 0, 1, 1], [], []>} : vector<8x8xf32>, vector<8x128xf32>, vector<8x128xf32> -> vector<8x128xf32>
      %164 = arith.addf %156, %163 : vector<8x128xf32>
      %c120_i32 = arith.constant 120 : i32
      %165 = tpu.dynamic_rotate %111 by %c120_i32 dim 1 : vector<8x128xf32>, i32 -> vector<8x128xf32>
      %166 = vector.extract_strided_slice %112 {offsets = [7, 0], sizes = [1, 128], strides = [1, 1]} : vector<9x128xf32> to vector<1x128xf32>
      %167 = vector.broadcast %166 : vector<1x128xf32> to vector<8x128xf32>
      %168 = arith.mulf %165, %167 : vector<8x128xf32>
      %169 = vector.extract_strided_slice %113 {offsets = [7, 0, 0], sizes = [1, 8, 8], strides = [1, 1, 1]} : vector<9x8x8xf32> to vector<1x8x8xf32>
      %170 = vector.shape_cast %169 : vector<1x8x8xf32> to vector<8x8xf32>
      %cst_52 = arith.constant dense<0.000000e+00> : vector<8x128xf32>
      %171 = tpu.matmul %170, %168, %cst_52 {dimension_numbers = #tpu.dot_dimension_numbers<[1], [0], [0], [1], [0, 0, 1, 1], [], []>} : vector<8x8xf32>, vector<8x128xf32>, vector<8x128xf32> -> vector<8x128xf32>
      %172 = arith.addf %164, %171 : vector<8x128xf32>
      %c119_i32 = arith.constant 119 : i32
      %173 = tpu.dynamic_rotate %111 by %c119_i32 dim 1 : vector<8x128xf32>, i32 -> vector<8x128xf32>
      %174 = vector.extract_strided_slice %112 {offsets = [8, 0], sizes = [1, 128], strides = [1, 1]} : vector<9x128xf32> to vector<1x128xf32>
      %175 = vector.broadcast %174 : vector<1x128xf32> to vector<8x128xf32>
      %176 = arith.mulf %173, %175 : vector<8x128xf32>
      %177 = vector.extract_strided_slice %113 {offsets = [8, 0, 0], sizes = [1, 8, 8], strides = [1, 1, 1]} : vector<9x8x8xf32> to vector<1x8x8xf32>
      %178 = vector.shape_cast %177 : vector<1x8x8xf32> to vector<8x8xf32>
      %cst_53 = arith.constant dense<0.000000e+00> : vector<8x128xf32>
      %179 = tpu.matmul %178, %176, %cst_53 {dimension_numbers = #tpu.dot_dimension_numbers<[1], [0], [0], [1], [0, 0, 1, 1], [], []>} : vector<8x8xf32>, vector<8x128xf32>, vector<8x128xf32> -> vector<8x128xf32>
      %180 = arith.addf %172, %179 : vector<8x128xf32>
      %c1_i32_54 = arith.constant 1 : i32
      %181 = arith.cmpi eq, %arg0, %c1_i32_54 : i32
      %182 = arith.extui %181 : i1 to i32
      %c0_i32_55 = arith.constant 0 : i32
      %183 = arith.cmpi ne, %182, %c0_i32_55 : i32
      scf.if %183 {
        %c0_57 = arith.constant 0 : index
        %c0_58 = arith.constant 0 : index
        %187 = vector.load %arg14[%c0_57, %c0_58] : memref<8x1xf32, #tpu.memory_space<vmem>>, vector<8x1xf32>
        %cst_59 = arith.constant dense<0.000000e+00> : vector<8x1xf32>
        %188 = tpu.matmul %180, %8, %cst_59 {dimension_numbers = #tpu.dot_dimension_numbers<[1], [0], [0], [1], [0, 0, 1, 1], [], []>} : vector<8x128xf32>, vector<128x1xf32>, vector<8x1xf32> -> vector<8x1xf32>
        %189 = arith.addf %187, %188 : vector<8x1xf32>
        %c0_60 = arith.constant 0 : index
        %c0_61 = arith.constant 0 : index
        %190 = vector.load %arg14[%c0_60, %c0_61] : memref<8x1xf32, #tpu.memory_space<vmem>>, vector<8x1xf32>
        tpu.vector_store %arg14[%c0_60, %c0_61], %189 {strides = array<i32>} : memref<8x1xf32, #tpu.memory_space<vmem>>, vector<8x1xf32>,
        %c0_62 = arith.constant 0 : index
        %c0_63 = arith.constant 0 : index
        %191 = vector.load %arg15[%c0_62, %c0_63] : memref<8x1xf32, #tpu.memory_space<vmem>>, vector<8x1xf32>
        %192 = arith.mulf %180, %180 : vector<8x128xf32>
        %cst_64 = arith.constant dense<0.000000e+00> : vector<8x1xf32>
        %193 = tpu.matmul %192, %8, %cst_64 {dimension_numbers = #tpu.dot_dimension_numbers<[1], [0], [0], [1], [0, 0, 1, 1], [], []>} : vector<8x128xf32>, vector<128x1xf32>, vector<8x1xf32> -> vector<8x1xf32>
        %194 = arith.addf %191, %193 : vector<8x1xf32>
        %c0_65 = arith.constant 0 : index
        %c0_66 = arith.constant 0 : index
        %195 = vector.load %arg15[%c0_65, %c0_66] : memref<8x1xf32, #tpu.memory_space<vmem>>, vector<8x1xf32>
        tpu.vector_store %arg15[%c0_65, %c0_66], %194 {strides = array<i32>} : memref<8x1xf32, #tpu.memory_space<vmem>>, vector<8x1xf32>,
      } else {
      }
      %c2_i32 = arith.constant 2 : i32
      %184 = arith.cmpi eq, %arg0, %c2_i32 : i32
      %185 = arith.extui %184 : i1 to i32
      %c0_i32_56 = arith.constant 0 : i32
      %186 = arith.cmpi ne, %185, %c0_i32_56 : i32
      scf.if %186 {
        %c0_57 = arith.constant 0 : index
        %c0_58 = arith.constant 0 : index
        %187 = vector.load %arg14[%c0_57, %c0_58] : memref<8x1xf32, #tpu.memory_space<vmem>>, vector<8x1xf32>
        %cst_59 = arith.constant 7.812500e-03 : f32
        %188 = vector.broadcast %cst_59 : f32 to vector<8x1xf32>
        %189 = arith.mulf %187, %188 : vector<8x1xf32>
        %c0_60 = arith.constant 0 : index
        %c0_61 = arith.constant 0 : index
        %190 = vector.load %arg15[%c0_60, %c0_61] : memref<8x1xf32, #tpu.memory_space<vmem>>, vector<8x1xf32>
        %cst_62 = arith.constant 7.812500e-03 : f32
        %191 = vector.broadcast %cst_62 : f32 to vector<8x1xf32>
        %192 = arith.mulf %190, %191 : vector<8x1xf32>
        %193 = arith.mulf %189, %189 : vector<8x1xf32>
        %194 = arith.subf %192, %193 : vector<8x1xf32>
        %cst_63 = arith.constant 0.000000e+00 : f32
        %195 = vector.broadcast %cst_63 : f32 to vector<8x1xf32>
        %196 = arith.maximumf %194, %195 : vector<8x1xf32>
        %c0_64 = arith.constant 0 : index
        %c0_65 = arith.constant 0 : index
        %197 = vector.load %arg9[%c0_64, %c0_65] : memref<8x1xf32, #tpu.memory_space<vmem>>, vector<8x1xf32>
        %cst_66 = arith.constant 9.99999974E-6 : f32
        %198 = vector.broadcast %cst_66 : f32 to vector<8x1xf32>
        %199 = arith.addf %196, %198 : vector<8x1xf32>
        %200 = math.rsqrt %199 : vector<8x1xf32>
        %201 = arith.mulf %197, %200 : vector<8x1xf32>
        %c0_67 = arith.constant 0 : index
        %c0_68 = arith.constant 0 : index
        %202 = vector.load %arg10[%c0_67, %c0_68] : memref<8x1xf32, #tpu.memory_space<vmem>>, vector<8x1xf32>
        %203 = arith.mulf %189, %201 : vector<8x1xf32>
        %204 = arith.subf %202, %203 : vector<8x1xf32>
        %cst_69 = arith.constant 0.000000e+00 : f32
        %205 = vector.broadcast %cst_69 : f32 to vector<2x128xf32>
        %206 = vector.extract_strided_slice %5 {offsets = [0, 0, 0], sizes = [1, 4, 128], strides = [1, 1, 1]} : vector<4x4x128xf32> to vector<1x4x128xf32>
        %207 = vector.shape_cast %206 : vector<1x4x128xf32> to vector<4x128xf32>
        %208 = tpu.concatenate %205, %207, %205 in 0 : vector<2x128xf32>, vector<4x128xf32>, vector<2x128xf32> -> vector<8x128xf32>
        %209 = vector.broadcast %201 : vector<8x1xf32> to vector<8x128xf32>
        %210 = arith.mulf %180, %209 : vector<8x128xf32>
        %211 = vector.broadcast %204 : vector<8x1xf32> to vector<8x128xf32>
        %212 = arith.addf %210, %211 : vector<8x128xf32>
        %213 = arith.addf %212, %208 : vector<8x128xf32>
        %cst_70 = arith.constant 0.000000e+00 : f32
        %214 = vector.broadcast %cst_70 : f32 to vector<8x128xf32>
        %215 = arith.maximumf %213, %214 : vector<8x128xf32>
        %c0_71 = arith.constant 0 : index
        %c0_72 = arith.constant 0 : index
        %216 = vector.load %arg11[%c0_71, %c0_72] : memref<8x128xf32, #tpu.memory_space<vmem>>, vector<8x128xf32>
        tpu.vector_store %arg11[%c0_71, %c0_72], %215 {strides = array<i32>} : memref<8x128xf32, #tpu.memory_space<vmem>>, vector<8x128xf32>,
      } else {
      }
    } else {
    }
    return
  }
  func.func @transform_0(%arg0: i32, %arg1: i32) -> (i32, i32, i32) {
    %c0_i32 = arith.constant 0 : i32
    %c0_i32_0 = arith.constant 0 : i32
    %c0_i32_1 = arith.constant 0 : i32
    return %c0_i32, %c0_i32_0, %arg1 : i32, i32, i32
  }
  func.func @transform_1(%arg0: i32, %arg1: i32) -> (i32, i32) {
    %c0_i32 = arith.constant 0 : i32
    %c0_i32_0 = arith.constant 0 : i32
    %c0_i32_1 = arith.constant 0 : i32
    return %c0_i32, %c0_i32_0 : i32, i32
  }
  func.func @transform_2(%arg0: i32, %arg1: i32) -> (i32, i32) {
    %c0_i32 = arith.constant 0 : i32
    %c0_i32_0 = arith.constant 0 : i32
    %c0_i32_1 = arith.constant 0 : i32
    return %c0_i32, %c0_i32_0 : i32, i32
  }
  func.func @transform_3(%arg0: i32, %arg1: i32) -> (i32, i32, i32) {
    %c0_i32 = arith.constant 0 : i32
    %c0_i32_0 = arith.constant 0 : i32
    %c0_i32_1 = arith.constant 0 : i32
    %c0_i32_2 = arith.constant 0 : i32
    return %c0_i32, %c0_i32_0, %c0_i32_1 : i32, i32, i32
  }
  func.func @transform_4(%arg0: i32, %arg1: i32) -> (i32, i32) {
    %c0_i32 = arith.constant 0 : i32
    %c0_i32_0 = arith.constant 0 : i32
    %c0_i32_1 = arith.constant 0 : i32
    return %c0_i32, %c0_i32_0 : i32, i32
  }
  func.func @transform_5(%arg0: i32, %arg1: i32) -> (i32, i32) {
    %c0_i32 = arith.constant 0 : i32
    %c0_i32_0 = arith.constant 0 : i32
    %c0_i32_1 = arith.constant 0 : i32
    return %c0_i32, %c0_i32_0 : i32, i32
  }
  func.func @transform_6(%arg0: i32, %arg1: i32) -> (i32, i32, i32) {
    %c0_i32 = arith.constant 0 : i32
    %c0_i32_0 = arith.constant 0 : i32
    %c0_i32_1 = arith.constant 0 : i32
    %c0_i32_2 = arith.constant 0 : i32
    return %c0_i32, %c0_i32_0, %c0_i32_1 : i32, i32, i32
  }
  func.func @transform_7(%arg0: i32, %arg1: i32) -> (i32, i32) {
    %c0_i32 = arith.constant 0 : i32
    %c0_i32_0 = arith.constant 0 : i32
    %c0_i32_1 = arith.constant 0 : i32
    return %c0_i32, %c0_i32_0 : i32, i32
  }
  func.func @transform_8(%arg0: i32, %arg1: i32) -> (i32, i32) {
    %c0_i32 = arith.constant 0 : i32
    %c0_i32_0 = arith.constant 0 : i32
    %c0_i32_1 = arith.constant 0 : i32
    return %c0_i32, %c0_i32_0 : i32, i32
  }
  func.func @transform_9(%arg0: i32, %arg1: i32) -> (i32, i32) {
    %c0_i32 = arith.constant 0 : i32
    %c0_i32_0 = arith.constant 0 : i32
    return %c0_i32, %arg1 : i32, i32
  }
}

</mosaic_0001>

<bundles_post_ra>
// kernel: tpu_custom_call.1
= control target key start
LH: loop header
LB: loop body
LE: loop exit
PB: predicated region body
PF: predicated region fallthrough
CT: control target
= control target key end

     0   :  { %14 = vsyncpa [#allocation7], 0  ;;  %s1352_s30 = smov 0   ;;  %s1354_s10 = smov 0   ;;  %s1522_s0 = inlined_call_operand.vmem [shape: f32[4,4,128], index: 0, kind: input, shape index: {}]   ;;  %s1523_s1 = inlined_call_operand.vmem [shape: f32[9,128], index: 1, kind: input, shape index: {}]   ;;  %s1524_s2 = inlined_call_operand.vmem [shape: f32[9,128], index: 2, kind: input, shape index: {}]   ;;  %s1525_s3 = inlined_call_operand.vmem [shape: f32[9,8,4], index: 3, kind: input, shape index: {}]   ;;  %s1526_s4 = inlined_call_operand.vmem [shape: f32[8,1], index: 4, kind: input, shape index: {}]   ;;  %s1527_s5 = inlined_call_operand.vmem [shape: f32[8,1], index: 5, kind: input, shape index: {}]   ;;  %s1528_s6 = inlined_call_operand.vmem [shape: f32[9,8,8], index: 6, kind: input, shape index: {}]   ;;  %s1529_s7 = inlined_call_operand.vmem [shape: f32[8,1], index: 7, kind: input, shape index: {}]   ;;  %s1530_s8 = inlined_call_operand.vmem [shape: f32[8,1], index: 8, kind: input, shape index: {}]   ;;  %s1531_s9 = inlined_call_operand.hbm [shape: f32[8,128], index: 9, kind: output, shape index: {}]  }
   0x1   :  { %s1356_s11 = smov 0  }
   0x2 LB: > { %s1134_s12 = sadd.s32 4294967295, %s1283_s11   ;;  %s32_s13 = sadd.s32 1, %s1279_s10  ;;  %s1283_s11 = sphi %s1356_s11, %s20_s11   ;;  %s1279_s10 = sphi %s1354_s10, %s1533_s10   ;;  %s1275_s30 = sphi %s1352_s30, %s1532_s30  }
   0x3   : > { %p34_p0 = scmp.ge.s32.totalorder %s32_s13, 3  ;;  %p1137_p1 = scmp.ge.s32.totalorder %s1283_s11, 1 }
   0x4   : > { %p299_p2 = scmp.lt.s32.totalorder %s1283_s11, 4 }
   0x5   : > { %s1535_s13 = smov (%p34_p0, %s32_s13), 0 }
   0x6   : > { %p300_p3 = pnand %p1137_p1, %p299_p2 }
   0x7   : > { %p333_p4 = scmp.eq.s32.totalorder (!%p300_p3), %s1275_s30, 0 }
   0x8   : > { %303 = sbr.rel (%p300_p3) target bundleno = 1221 (0x4c5), region = 56 }
   0xd   : > { %338 = sbr.rel (!%p333_p4) target bundleno = 18 (0x12), region = 60  ;;  %vm339_vm0 = vcmask (%p333_p4), 7168   ;;  %v1285_v0 = vmov (%p333_p4), 0.0  }
   0xe   : > { %340 = vst.msk [vmem:[#allocation2] sm:$0xff] (%p333_p4), %vm339_vm0, %v1285_v0 }
   0xf   : > { %341 = vst.msk [vmem:[#allocation3] sm:$0xff] (%p333_p4), %vm339_vm0, %v1285_v0 }
  0x10   : > { %342 = vst.msk [vmem:[#allocation4] sm:$0xff] (%p333_p4), %vm339_vm0, %v1285_v0 }
  0x11   : > { %343 = vst.msk [vmem:[#allocation5] sm:$0xff] (%p333_p4), %vm339_vm0, %v1285_v0 }
  0x12 PF: > { %v347_v1 = vld [vmem:[%s1522_s0 + $0xc] sm:$0xf]  ;;  %v345_v2 = vld [vmem:[%s1522_s0 + $0x4] sm:$0xf]  ;;  %s1286_s18 = smov 8   ;;  %s1287_s19 = smov 1  }
  0x13   : > { %420 = vrot.lane.b32.xlu0 %v347_v1, %s1286_s18  ;;  %451 = vrot.lane.b32.xlu1 %v345_v2, %s1287_s19  ;;  %v346_v3 = vld [vmem:[%s1522_s0 + $0x8] sm:$0xf]  ;;  %s1288_s22 = smov 9   ;;  %v348_v4 = vld [vmem:[%s1523_s1] sm:$0xff]  ;;  %vm370_vm1 = vcmask 1043456   ;;  %vm366_vm2 = vcmask 31744  }
  0x14   : > { %536 = vrot.lane.b32.xlu2 %v347_v1, %s1287_s19  ;;  %v422_v5 = vperm.slane %v348_v4, 2  ;;  %v453_v6 = vperm.slane %v348_v4, 3  ;;  %v538_v7 = vperm.slane %v348_v4, 6  ;;  %v351_v14 = vld [vmem:[%s1525_s3 + $0x10] sm:$0xff]  ;;  %v352_v15 = vld [vmem:[%s1525_s3 + $0x18] sm:$0xff]  ;;  %v364_v16 = vperm.slane %v348_v4, 1 }
  0x15   : > { %v360_v17 = vperm.slane %v348_v4, 0  ;;  %v350_v22 = vld [vmem:[%s1525_s3 + $0x8] sm:$0xff]  ;;  %v349_v23 = vld [vmem:[%s1525_s3] sm:$0xff]  ;;  %v355_v25 = vld [vmem:[%s1525_s3 + $0x30] sm:$0xff]  ;;  %p1157_p5 = scmp.ne.s32.totalorder %s1275_s30, 0 }
  0x16   : > { %v1407_v24 = vld [vmem:[%s1522_s0] sm:$0xf]  ;;  %v356_v26 = vld [vmem:[%s1525_s3 + $0x38] sm:$0xff]  ;;  %v354_v28 = vld [vmem:[%s1525_s3 + $0x28] sm:$0xff] }
  0x17   : > { %v353_v27 = vld [vmem:[%s1525_s3 + $0x20] sm:$0xff] }
  0x18   : > { %v357_v29 = vld [vmem:[%s1525_s3 + $0x40] sm:$0xff] }
  0x1b   : > { %362 = vrot.lane.b32.xlu0 %v346_v3, %s1286_s18  ;;  %358 = vrot.lane.b32.xlu1 %v347_v1, %s1288_s22 }
  0x6e   : > { %v537_v8 = vpop.permute.xlu2 %536 }
  0x6f   : > { %v539_v13 = vmul.f32 %v538_v7, %v537_v8 }
  0x85   : > { %v421_v9 = vpop.permute.xlu0 %420  ;;  %v452_v10 = vpop.permute.xlu1 %451 }
  0x86   : > { %v423_v11 = vmul.f32 %v422_v5, %v421_v9  ;;  %v454_v12 = vmul.f32 %v453_v6, %v452_v10 }
  0x88   : > { %1143 = vmatpush.msk.msra.mxu2 %vm370_vm1, %v423_v11  ;;  %1145 = vmatpush.msk.msra.mxu3 %vm370_vm1, %v454_v12 }
  0x89   : > { %1144 = vmatmul.msk.f32.vlgmr.msra.gmra.mxu2 %vm366_vm2, %v351_v14  ;;  %1146 = vmatmul.msk.f32.vlgmr.msra.gmra.mxu3 %vm366_vm2, %v352_v15 }
  0x8a   : > { %1151 = vmatpush.msk.msrb.mxu2 %vm370_vm1, %v539_v13  ;;  %1153 = vmatpush.msk.msrb.mxu3 %vm370_vm1, %v346_v3 }
  0x8d   : > { %v363_v18 = vpop.permute.xlu0 %362  ;;  %v359_v19 = vpop.permute.xlu1 %358 }
  0x8e   : > { %v365_v20 = vmul.f32 %v364_v16, %v363_v18  ;;  %v361_v21 = vmul.f32 %v360_v17, %v359_v19 }
  0x90   : > { %1139 = vmatpush.msk.msra.mxu0 %vm370_vm1, %v365_v20  ;;  %1141 = vmatpush.msk.msra.mxu1 %vm370_vm1, %v361_v21 }
  0x91   : > { %1140 = vmatmul.msk.f32.vlgmr.msra.gmra.mxu0 %vm366_vm2, %v350_v22  ;;  %1142 = vmatmul.msk.f32.vlgmr.msra.gmra.mxu1 %vm366_vm2, %v349_v23 }
  0x92   : > { %1147 = vmatpush.msk.msrb.mxu0 %vm370_vm1, %v1407_v24  ;;  %1149 = vmatpush.msk.msrb.mxu1 %vm370_vm1, %v345_v2 }
  0x93   : > { %1152 = vmatmul.msk.f32.vlgmr.msrb.gmra.mxu2 %vm366_vm2, %v355_v25  ;;  %1154 = vmatmul.msk.f32.vlgmr.msrb.gmra.mxu3 %vm366_vm2, %v356_v26 }
  0x94   : > { %1155 = vmatpush.msk.msra.mxu0 %vm370_vm1, %v347_v1 }
  0x99   : > { %1148 = vmatmul.msk.f32.vlgmr.msrb.gmra.mxu0 %vm366_vm2, %v353_v27  ;;  %1150 = vmatmul.msk.f32.vlgmr.msrb.gmra.mxu1 %vm366_vm2, %v354_v28 }
  0xa1   : > { %1156 = vmatmul.msk.f32.vlgmr.msra.gmra.mxu0 %vm366_vm2, %v357_v29 }
 0x10c   : > { %v447_v30 = vpop.f32.mrf.mxu2  ;;  %v478_v35 = vpop.f32.mrf.mxu3 }
 0x10e   : > { %v391_v31 = vpop.f32.mrf.mxu0  ;;  %v417_v32 = vpop.f32.mrf.mxu1 }
 0x10f   : > { %v418_v33 = vadd.f32 %v417_v32, %v391_v31 }
 0x111   : > { %v450_v34 = vadd.f32 %v447_v30, %v418_v33 }
 0x113   : > { %v481_v36 = vadd.f32 %v478_v35, %v450_v34 }
 0x116   : > { %v505_v37 = vpop.f32.mrf.mxu0  ;;  %v532_v38 = vpop.f32.mrf.mxu1 }
 0x117   : > { %v508_v39 = vadd.f32 %v505_v37, %v481_v36  ;;  %v563_v40 = vpop.f32.mrf.mxu2  ;;  %v590_v42 = vpop.f32.mrf.mxu3 }
 0x119   : > { %v535_v41 = vadd.f32 %v532_v38, %v508_v39 }
 0x11b   : > { %v566_v43 = vadd.f32 %v563_v40, %v535_v41  ;;  %623 = sbr.rel (%p1157_p5) target bundleno = 450 (0x1c2), region = 64 }
 0x11d   : > { %v593_v44 = vadd.f32 %v590_v42, %v566_v43 }
 0x11e   : > { %v617_v45 = vpop.f32.mrf.mxu0 }
 0x11f   : > { %v1437_v46 = vadd.f32 %v617_v45, %v593_v44 }
 0x120   : > { %v1289_v47 = vmov 1.0   ;;  %v624_v49 = vld [vmem:[#allocation2] sm:$0xff]  ;;  %v648_v50 = vld [vmem:[#allocation3] sm:$0xff]  ;;  %vm646_vm3 = vcmask 7168  }
 0x121   : > { %625 = vmatpush.msra.mxu0 %v1289_v47  ;;  %650 = vmatpush.msra.mxu1 %v1289_v47  ;;  %v649_v48 = vmul.f32 %v1437_v46, %v1437_v46 }
 0x123   : > { %626 = vmatpush.msra.mxu0 %v1289_v47  ;;  %651 = vmatpush.msra.mxu1 %v1289_v47 }
 0x125   : > { %627 = vmatpush.msra.mxu0 %v1289_v47  ;;  %652 = vmatpush.msra.mxu1 %v1289_v47 }
 0x127   : > { %628 = vmatpush.msra.mxu0 %v1289_v47  ;;  %653 = vmatpush.msra.mxu1 %v1289_v47 }
 0x129   : > { %629 = vmatpush.msra.mxu0 %v1289_v47  ;;  %654 = vmatpush.msra.mxu1 %v1289_v47 }
 0x12b   : > { %630 = vmatpush.msra.mxu0 %v1289_v47  ;;  %655 = vmatpush.msra.mxu1 %v1289_v47 }
 0x12d   : > { %631 = vmatpush.msra.mxu0 %v1289_v47  ;;  %656 = vmatpush.msra.mxu1 %v1289_v47 }
 0x12f   : > { %632 = vmatpush.msra.mxu0 %v1289_v47  ;;  %657 = vmatpush.msra.mxu1 %v1289_v47 }
 0x131   : > { %633 = vmatpush.msra.mxu0 %v1289_v47  ;;  %658 = vmatpush.msra.mxu1 %v1289_v47 }
 0x133   : > { %634 = vmatpush.msra.mxu0 %v1289_v47  ;;  %659 = vmatpush.msra.mxu1 %v1289_v47 }
 0x135   : > { %635 = vmatpush.msra.mxu0 %v1289_v47  ;;  %660 = vmatpush.msra.mxu1 %v1289_v47 }
 0x137   : > { %636 = vmatpush.msra.mxu0 %v1289_v47  ;;  %661 = vmatpush.msra.mxu1 %v1289_v47 }
 0x139   : > { %637 = vmatpush.msra.mxu0 %v1289_v47  ;;  %662 = vmatpush.msra.mxu1 %v1289_v47 }
 0x13b   : > { %638 = vmatpush.msra.mxu0 %v1289_v47  ;;  %663 = vmatpush.msra.mxu1 %v1289_v47 }
 0x13d   : > { %639 = vmatpush.msra.mxu0 %v1289_v47  ;;  %664 = vmatpush.msra.mxu1 %v1289_v47 }
 0x13f   : > { %640 = vmatpush.msra.mxu0 %v1289_v47  ;;  %665 = vmatpush.msra.mxu1 %v1289_v47 }
 0x140   : > { %641 = vmatmul.f32.vlgmr.msra.gmra.mxu0 %v1437_v46  ;;  %666 = vmatmul.f32.vlgmr.msra.gmra.mxu1 %v649_v48 }
 0x1bd   : > { %v642_v51 = vpop.f32.mrf.mxu0  ;;  %v667_v52 = vpop.f32.mrf.mxu1 }
 0x1be   : > { %v645_v53 = vadd.f32 %v642_v51, %v624_v49  ;;  %v670_v54 = vadd.f32 %v667_v52, %v648_v50 }
 0x1c0   : > { %647 = vst.msk [vmem:[#allocation2] sm:$0xff] %vm646_vm3, %v645_v53 }
 0x1c1   : > { %671 = vst.msk [vmem:[#allocation3] sm:$0xff] %vm646_vm3, %v670_v54 }
 0x1c2 PF: > { %p1158_p6 = scmp.le.s32.totalorder %s1275_s30, 0 }
 0x1c3   : > { %s1291_s17 = smov (!%p1158_p6), 121   ;;  %s1292_s18 = smov (!%p1158_p6), 1  }
 0x1c4   : > { %675 = sbr.rel (%p1158_p6) target bundleno = 1215 (0x4bf), region = 68  ;;  %s1293_s19 = smov (!%p1158_p6), 7  }
 0x1c5   : > { %s1294_s20 = smov (!%p1158_p6), 119   ;;  %s1295_s21 = smov (!%p1158_p6), 9  }
 0x1c6   : > { %s1296_s22 = smov (!%p1158_p6), 8   ;;  %s1297_s23 = smov (!%p1158_p6), 127  }
 0x1c7   : > { %s1298_s24 = smov (!%p1158_p6), 120   ;;  %p1168_p7 = scmp.ne.s32.totalorder (!%p1158_p6), %s1275_s30, 1 }
 0x1c9   : > { %v676_v55 = vld [vmem:[#allocation2] sm:$0xff]  ;;  %v678_v56 = vld [vmem:[#allocation3] sm:$0xff]  ;;  %v1290_v57 = vmov 0   ;;  %vm731_vm7 = vcmask 64512   ;;  %v717_v21 = vld [vmem:[%s1528_s6 + $0x18] sm:$0xff] }
 0x1ca   : > { %1222 = vset.pattern.permute.xlu0 %v1290_v57  ;;  %v677_v58 = vmul.f32 0.0078125, %v676_v55  ;;  %v679_v59 = vmul.f32 0.0078125, %v678_v56  ;;  %v683_v5 = vld [vmem:[%s1526_s4] sm:$0xff]  ;;  %v719_v30 = vld [vmem:[%s1528_s6 + $0x28] sm:$0xff]  ;;  %v716_v37 = vld [vmem:[%s1528_s6 + $0x10] sm:$0xff] }
 0x1cb   : > { %v696_v10 = vld [vmem:[%s1527_s5] sm:$0xff]  ;;  %v1223_v39 = vld [vmem:[%s1524_s2 + $0x8] ss:$0 sm:$0xff]  ;;  %v720_v44 = vld [vmem:[%s1528_s6 + $0x30] sm:$0xff] }
 0x1cc   : > { %v680_v60 = vmul.f32 %v677_v58, %v677_v58  ;;  %v712_v17 = vld [vmem:[%s1524_s2] sm:$0xff]  ;;  %v715_v43 = vld [vmem:[%s1528_s6 + $0x8] sm:$0xff]  ;;  %v721_v49 = vld [vmem:[%s1528_s6 + $0x38] sm:$0xff] }
 0x1cd   : > { %v808_v18 = vperm.slane %v712_v17, 3  ;;  %v725_v22 = vperm.slane %v712_v17, 0  ;;  %v714_v26 = vld [vmem:[%s1528_s6] sm:$0xff]  ;;  %v860_v27 = vperm.slane %v712_v17, 5  ;;  %v888_v31 = vperm.slane %v712_v17, 6 }
 0x1ce   : > { %v681_v61 = vsub.f32 %v679_v59, %v680_v60  ;;  %v780_v32 = vperm.slane %v712_v17, 2  ;;  %v729_v38 = vperm.slane %v712_v17, 1  ;;  %v718_v50 = vld [vmem:[%s1528_s6 + $0x20] sm:$0xff] }
 0x1cf   : > { %v722_v51 = vld [vmem:[%s1528_s6 + $0x40] sm:$0xff] }
 0x1d0   : > { %v682_v62 = vmax.f32 %v681_v61, 0.0 }
 0x1d2   : > { %v684_v63 = vadd.f32 1e-05, %v682_v62 }
 0x1d4   : > { %1224 = vrsqrt.f32 %v684_v63  ;;  %vm691_vm4 = vweird.f32 %v684_v63 }
 0x1da   : > { %v1225_v0 = vpop.eup %1224 }
 0x1db   : > { %v686_v1 = vmul.f32 %v1225_v0, %v684_v63  ;;  %vm692_vm5 = vweird.f32 %v1225_v0 }
 0x1dc   : > { %vm693_vm6 = vmor %vm691_vm4, %vm692_vm5 }
 0x1dd   : > { %v687_v2 = vmul.f32 %v1225_v0, %v686_v1 }
 0x1df   : > { %v688_v3 = vmul.f32 0.5, %v687_v2 }
 0x1e1   : > { %v689_v4 = vsub.f32 1.5, %v688_v3 }
 0x1e3   : > { %v690_v6 = vmul.f32 %v1225_v0, %v689_v4 }
 0x1e5   : > { %v694_v7 = vsel %vm693_vm6, %v1225_v0, %v690_v6 }
 0x1e6   : > { %v695_v8 = vmul.f32 %v694_v7, %v683_v5 }
 0x1e8   : > { %701 = vperm.xlu0 %1222, %v695_v8   ;;  %v697_v9 = vmul.f32 %v695_v8, %v677_v58 }
 0x1ea   : > { %v698_v11 = vsub.f32 %v696_v10, %v697_v9 }
 0x1f0   : > { %707 = vperm.xlu0 %1222, %v698_v11  }
 0x25a   : > { %v702_v12 = vpop.permute.xlu0 %701 }
 0x25b   : > { %v704_v13 = vmul.f32 %v702_v12, %v1437_v46  ;;  %v916_v46 = vperm.slane %v712_v17, 7 }
 0x262   : > { %v708_v14 = vpop.permute.xlu0 %707 }
 0x263   : > { %v710_v15 = vadd.f32 %v708_v14, %v704_v13 }
 0x265   : > { %v711_v16 = vmax.f32 %v710_v15, 0.0 }
 0x267   : > { %886 = vrot.lane.b32.xlu0 %v711_v16, %s1291_s17  ;;  %806 = vrot.lane.b32.xlu2 %v711_v16, %s1292_s18 }
 0x268   : > { %778 = vrot.lane.b32.xlu1 %v711_v16, %s1293_s19 }
 0x26f   : > { %942 = vrot.lane.b32.xlu0 %v711_v16, %s1294_s20  ;;  %723 = vrot.lane.b32.xlu2 %v711_v16, %s1295_s21 }
 0x270   : > { %727 = vrot.lane.b32.xlu1 %v711_v16, %s1296_s22 }
 0x277   : > { %858 = vrot.lane.b32.xlu2 %v711_v16, %s1297_s23 }
 0x278   : > { %914 = vrot.lane.b32.xlu1 %v711_v16, %s1298_s24 }
 0x2c1   : > { %v807_v19 = vpop.permute.xlu2 %806 }
 0x2c2   : > { %v809_v20 = vmul.f32 %v808_v18, %v807_v19 }
 0x2c4   : > { %828 = vmatpush.msra.mxu3 %v809_v20 }
 0x2c5   : > { %1162 = vmatmul.msk.f32.vlgmr.msra.gmra.mxu3 %vm731_vm7, %v717_v21 }
 0x2c9   : > { %v724_v23 = vpop.permute.xlu2 %723 }
 0x2ca   : > { %v726_v25 = vmul.f32 %v725_v22, %v724_v23 }
 0x2cc   : > { %773 = vmatpush.msra.mxu1 %v726_v25 }
 0x2cd   : > { %1160 = vmatmul.msk.f32.vlgmr.msra.gmra.mxu1 %vm731_vm7, %v714_v26 }
 0x2d1   : > { %v859_v28 = vpop.permute.xlu2 %858 }
 0x2d2   : > { %v861_v29 = vmul.f32 %v860_v27, %v859_v28 }
 0x2d4   : > { %880 = vmatpush.msrb.mxu1 %v861_v29 }
 0x2d5   : > { %1164 = vmatmul.msk.f32.vlgmr.msrb.gmra.mxu1 %vm731_vm7, %v719_v30 }
 0x2d9   : > { %v887_v33 = vpop.permute.xlu0 %886 }
 0x2da   : > { %v889_v34 = vmul.f32 %v888_v31, %v887_v33  ;;  %v779_v35 = vpop.permute.xlu1 %778 }
 0x2db   : > { %v781_v36 = vmul.f32 %v780_v32, %v779_v35 }
 0x2dd   : > { %800 = vmatpush.msra.mxu2 %v781_v36 }
 0x2de   : > { %1161 = vmatmul.msk.f32.vlgmr.msra.gmra.mxu2 %vm731_vm7, %v716_v37 }
 0x2df   : > { %908 = vmatpush.msrb.mxu2 %v889_v34 }
 0x2e1   : > { %v943_v41 = vpop.permute.xlu0 %942 }
 0x2e2   : > { %v728_v40 = vpop.permute.xlu1 %727  ;;  %v945_v45 = vmul.f32 %v1223_v39, %v943_v41 }
 0x2e3   : > { %v730_v42 = vmul.f32 %v729_v38, %v728_v40 }
 0x2e5   : > { %750 = vmatpush.msra.mxu0 %v730_v42 }
 0x2e6   : > { %1159 = vmatmul.msk.f32.vlgmr.msra.gmra.mxu0 %vm731_vm7, %v715_v43  ;;  %1165 = vmatmul.msk.f32.vlgmr.msrb.gmra.mxu2 %vm731_vm7, %v720_v44 }
 0x2e7   : > { %852 = vmatpush.msrb.mxu0 %v711_v16 }
 0x2e9   : > { %964 = vmatpush.msra.mxu0 %v945_v45 }
 0x2ea   : > { %v915_v47 = vpop.permute.xlu1 %914 }
 0x2eb   : > { %v917_v48 = vmul.f32 %v916_v46, %v915_v47 }
 0x2ed   : > { %936 = vmatpush.msrb.mxu3 %v917_v48 }
 0x2ee   : > { %1166 = vmatmul.msk.f32.vlgmr.msrb.gmra.mxu3 %vm731_vm7, %v721_v49  ;;  %1163 = vmatmul.msk.f32.vlgmr.msrb.gmra.mxu0 %vm731_vm7, %v718_v50 }
 0x2f6   : > { %1167 = vmatmul.msk.f32.vlgmr.msra.gmra.mxu0 %vm731_vm7, %v722_v51 }
 0x348   : > { %v830_v57 = vpop.f32.mrf.mxu3 }
 0x34a   : > { %v775_v52 = vpop.f32.mrf.mxu1 }
 0x352   : > { %v882_v60 = vpop.f32.mrf.mxu1 }
 0x361   : > { %v802_v54 = vpop.f32.mrf.mxu2 }
 0x363   : > { %v752_v53 = vpop.f32.mrf.mxu0 }
 0x364   : > { %v776_v55 = vadd.f32 %v775_v52, %v752_v53 }
 0x366   : > { %v805_v56 = vadd.f32 %v802_v54, %v776_v55 }
 0x368   : > { %v833_v58 = vadd.f32 %v830_v57, %v805_v56 }
 0x369   : > { %v910_v62 = vpop.f32.mrf.mxu2 }
 0x36b   : > { %v854_v59 = vpop.f32.mrf.mxu0 }
 0x36c   : > { %v857_v61 = vadd.f32 %v854_v59, %v833_v58 }
 0x36e   : > { %v885_v63 = vadd.f32 %v882_v60, %v857_v61 }
 0x370   : > { %v913_v0 = vadd.f32 %v910_v62, %v885_v63  ;;  %973 = sbr.rel (%p1168_p7) target bundleno = 1047 (0x417), region = 72 }
 0x371   : > { %v938_v1 = vpop.f32.mrf.mxu3 }
 0x372   : > { %v941_v2 = vadd.f32 %v938_v1, %v913_v0 }
 0x373   : > { %v966_v3 = vpop.f32.mrf.mxu0 }
 0x374   : > { %v1493_v4 = vadd.f32 %v966_v3, %v941_v2 }
 0x375   : > { %v1299_v5 = vmov 1.0   ;;  %v974_v7 = vld [vmem:[#allocation4] sm:$0xff]  ;;  %v998_v8 = vld [vmem:[#allocation5] sm:$0xff]  ;;  %vm996_vm8 = vcmask 7168  }
 0x376   : > { %975 = vmatpush.msra.mxu0 %v1299_v5  ;;  %1000 = vmatpush.msra.mxu1 %v1299_v5  ;;  %v999_v6 = vmul.f32 %v1493_v4, %v1493_v4 }
 0x378   : > { %976 = vmatpush.msra.mxu0 %v1299_v5  ;;  %1001 = vmatpush.msra.mxu1 %v1299_v5 }
 0x37a   : > { %977 = vmatpush.msra.mxu0 %v1299_v5  ;;  %1002 = vmatpush.msra.mxu1 %v1299_v5 }
 0x37c   : > { %978 = vmatpush.msra.mxu0 %v1299_v5  ;;  %1003 = vmatpush.msra.mxu1 %v1299_v5 }
 0x37e   : > { %979 = vmatpush.msra.mxu0 %v1299_v5  ;;  %1004 = vmatpush.msra.mxu1 %v1299_v5 }
 0x380   : > { %980 = vmatpush.msra.mxu0 %v1299_v5  ;;  %1005 = vmatpush.msra.mxu1 %v1299_v5 }
 0x382   : > { %981 = vmatpush.msra.mxu0 %v1299_v5  ;;  %1006 = vmatpush.msra.mxu1 %v1299_v5 }
 0x384   : > { %982 = vmatpush.msra.mxu0 %v1299_v5  ;;  %1007 = vmatpush.msra.mxu1 %v1299_v5 }
 0x386   : > { %983 = vmatpush.msra.mxu0 %v1299_v5  ;;  %1008 = vmatpush.msra.mxu1 %v1299_v5 }
 0x388   : > { %984 = vmatpush.msra.mxu0 %v1299_v5  ;;  %1009 = vmatpush.msra.mxu1 %v1299_v5 }
 0x38a   : > { %985 = vmatpush.msra.mxu0 %v1299_v5  ;;  %1010 = vmatpush.msra.mxu1 %v1299_v5 }
 0x38c   : > { %986 = vmatpush.msra.mxu0 %v1299_v5  ;;  %1011 = vmatpush.msra.mxu1 %v1299_v5 }
 0x38e   : > { %987 = vmatpush.msra.mxu0 %v1299_v5  ;;  %1012 = vmatpush.msra.mxu1 %v1299_v5 }
 0x390   : > { %988 = vmatpush.msra.mxu0 %v1299_v5  ;;  %1013 = vmatpush.msra.mxu1 %v1299_v5 }
 0x392   : > { %989 = vmatpush.msra.mxu0 %v1299_v5  ;;  %1014 = vmatpush.msra.mxu1 %v1299_v5 }
 0x394   : > { %990 = vmatpush.msra.mxu0 %v1299_v5  ;;  %1015 = vmatpush.msra.mxu1 %v1299_v5 }
 0x395   : > { %991 = vmatmul.f32.vlgmr.msra.gmra.mxu0 %v1493_v4  ;;  %1016 = vmatmul.f32.vlgmr.msra.gmra.mxu1 %v999_v6 }
 0x412   : > { %v992_v9 = vpop.f32.mrf.mxu0  ;;  %v1017_v10 = vpop.f32.mrf.mxu1 }
 0x413   : > { %v995_v11 = vadd.f32 %v992_v9, %v974_v7  ;;  %v1020_v12 = vadd.f32 %v1017_v10, %v998_v8 }
 0x415   : > { %997 = vst.msk [vmem:[#allocation4] sm:$0xff] %vm996_vm8, %v995_v11 }
 0x416   : > { %1021 = vst.msk [vmem:[#allocation5] sm:$0xff] %vm996_vm8, %v1020_v12 }
 0x417 PF: > { %p1169_p8 = scmp.ne.s32.totalorder %s1275_s30, 2 }
 0x419   : > { %1025 = sbr.rel (%p1169_p8) target bundleno = 1215 (0x4bf), region = 76 }
 0x41e   : > { %v1026_v13 = vld [vmem:[#allocation4] sm:$0xff]  ;;  %v1028_v14 = vld [vmem:[#allocation5] sm:$0xff]  ;;  %v1300_v15 = vmov 0   ;;  %v1033_v28 = vld [vmem:[%s1529_s7] sm:$0xff]  ;;  %v1049_v36 = vrot.slane %v1407_v24, 6  ;;  %vm1051_vm12 = vcmask 1041408  }
 0x41f   : > { %1226 = vset.pattern.permute.xlu0 %v1300_v15  ;;  %v1027_v16 = vmul.f32 0.0078125, %v1026_v13  ;;  %v1029_v17 = vmul.f32 0.0078125, %v1028_v14  ;;  %v1046_v33 = vld [vmem:[%s1530_s8] sm:$0xff]  ;;  %vm1053_vm13 = vcmask 1045504  }
 0x420   : > { %v1052_v37 = vsel %vm1051_vm12, 0.0, %v1049_v36 }
 0x421   : > { %v1030_v18 = vmul.f32 %v1027_v16, %v1027_v16  ;;  %v1054_v39 = vsel %vm1053_vm13, %v1052_v37, 0.0 }
 0x423   : > { %v1031_v19 = vsub.f32 %v1029_v17, %v1030_v18 }
 0x425   : > { %v1032_v20 = vmax.f32 %v1031_v19, 0.0 }
 0x427   : > { %v1034_v21 = vadd.f32 1e-05, %v1032_v20 }
 0x429   : > { %1227 = vrsqrt.f32 %v1034_v21  ;;  %vm1041_vm9 = vweird.f32 %v1034_v21 }
 0x42f   : > { %v1228_v22 = vpop.eup %1227 }
 0x430   : > { %v1036_v23 = vmul.f32 %v1228_v22, %v1034_v21  ;;  %vm1042_vm10 = vweird.f32 %v1228_v22 }
 0x431   : > { %vm1043_vm11 = vmor %vm1041_vm9, %vm1042_vm10 }
 0x432   : > { %v1037_v25 = vmul.f32 %v1228_v22, %v1036_v23 }
 0x434   : > { %v1038_v26 = vmul.f32 0.5, %v1037_v25 }
 0x436   : > { %v1039_v27 = vsub.f32 1.5, %v1038_v26 }
 0x438   : > { %v1040_v29 = vmul.f32 %v1228_v22, %v1039_v27 }
 0x43a   : > { %v1044_v30 = vsel %vm1043_vm11, %v1228_v22, %v1040_v29 }
 0x43b   : > { %v1045_v31 = vmul.f32 %v1044_v30, %v1033_v28 }
 0x43d   : > { %1057 = vperm.xlu0 %1226, %v1045_v31   ;;  %v1047_v32 = vmul.f32 %v1045_v31, %v1027_v16 }
 0x43f   : > { %v1048_v34 = vsub.f32 %v1046_v33, %v1047_v32 }
 0x445   : > { %1063 = vperm.xlu0 %1226, %v1048_v34  }
 0x4af   : > { %v1058_v35 = vpop.permute.xlu0 %1057 }
 0x4b0   : > { %v1060_v38 = vmul.f32 %v1058_v35, %v1493_v4 }
 0x4b7   : > { %v1064_v40 = vpop.permute.xlu0 %1063 }
 0x4b8   : > { %v1066_v41 = vadd.f32 %v1064_v40, %v1060_v38 }
 0x4ba   : > { %v1067_v42 = vadd.f32 %v1066_v41, %v1054_v39 }
 0x4bc   : > { %v1068_v43 = vmax.f32 %v1067_v42, 0.0 }
 0x4be   : > { %1069 = vst [vmem:[#allocation6] sm:$0xff] %v1068_v43 }
 0x4bf PF: > { %p1179_p9 = scmp.eq.s32.totalorder %s1134_s12, 2  ;;  %s1080_s20 = sshll.u32 %s1531_s9, 4  ;;  %s1081_s20 = int_to_ptr.hbm [resolvable:$true] %s1080_s20 }
 0x4c0   : > { %s1301_s21 = smov [#allocation6]  }
 0x4c1   : > { %s1078_s22 = sshll.u32 %s1301_s21, 4  ;;  %s1079_s22 = int_to_ptr.vmem [resolvable:$true] %s1078_s22 }
 0x4c2   : > { %1176 = dma.vmem_to_hbm [thread:$0]  (%p1179_p9), %s1079_s22, 128, %s1081_s20, [#allocation7]  }
 0x4c3   : > { %1270 = dma.done.wait (%p1179_p9), [#allocation7], 128  }
 0x4c4   : > { %1272 = vsyncadd (%p1179_p9), [#allocation7], 4294967168 }
 0x4c5 PF: > { %s20_s11 = sadd.s32 1, %s1283_s11   ;;  %s1532_s30 = smov %s1279_s10 }
 0x4c6   : > { %p17_p10 = scmp.ge.s32.totalorder %s20_s11, 5   ;;  %s1533_s10 = smov %s1535_s13 }
 0x4c8   :  { %19 = sbr.rel (!%p17_p10) target bundleno = 2 (0x2), region = 104 }
 0x4cd   :  { %1094 = vsyncpa [#allocation7], 1 }
 0x4ce   :  { %1096 = vsyncpa [#allocation7 + $0x1], 1 }

</bundles_post_ra>
